<compile_context>
chip_gen: v6e
topology: v6e:2x2x1
jax: 0.10.0
libtpu: 0.0.40
codegen_flags: <defaults>
</compile_context>

<pallas_src>
import functools

import jax
import jax.numpy as jnp
from jax.experimental import pallas as pl
from jax.experimental.pallas import tpu as pltpu


def _bigram_gather_kernel(idx_ref, w_hbm, out_ref, sems):
    """Gather TN embedding rows from HBM straight into one (TN, Vpad) output block.

    idx_ref : (N_pad,) int32 in SMEM (scalar prefetch) - flat token ids
    w_hbm   : (V_rows_pad, V_cols_pad) f32 in HBM (pl.ANY) - embedding table
    out_ref : (TN, V_cols_pad) f32 VMEM output block (DMA destination)
    sems    : (TN,) DMA semaphores
    """
    tn = out_ref.shape[0]
    base = pl.program_id(0) * tn

    # Issue all row DMAs for this token block first (overlap the small copies),
    # then wait on all of them.  The DMAs write directly into the output block,
    # so no scratch buffer / extra VMEM copy is needed.
    copies = []
    for t in range(tn):                      # static -> fully unrolled
        tok = idx_ref[base + t]              # dynamic SMEM scalar read
        cp = pltpu.make_async_copy(w_hbm.at[tok], out_ref.at[t], sems.at[t])
        cp.start()
        copies.append(cp)
    for cp in copies:
        cp.wait()


def _round_up(x, m):
    return (x + m - 1) // m * m


@functools.partial(jax.jit, static_argnames=("tokens_per_step",))
def bigram_forward(idx, embedding_table, *, tokens_per_step=8):
    """idx: (B, T) int token ids; embedding_table: (V, V) f32 -> (B, T, V) logits."""
    B, T = idx.shape
    V = embedding_table.shape[0]
    N = B * T

    LANES, SUBLANES = 128, 8
    v_cols = _round_up(V, LANES)        # lane-dense output width (65 -> 128)
    v_rows = _round_up(V, SUBLANES)     # sublane-aligned table rows
    tn = tokens_per_step
    n_pad = _round_up(N, tn)

    # Pad the table (extra rows/cols zero) and the flat id vector (padded ids
    # point at row 0; those output rows are sliced off below).
    w_pad = jnp.zeros((v_rows, v_cols), jnp.float32).at[:V, :V].set(
        embedding_table.astype(jnp.float32))
    idx_flat = jnp.zeros((n_pad,), jnp.int32).at[:N].set(
        idx.reshape(N).astype(jnp.int32))

    logits_pad = pl.pallas_call(
        _bigram_gather_kernel,
        out_shape=jax.ShapeDtypeStruct((n_pad, v_cols), jnp.float32),
        grid_spec=pltpu.PrefetchScalarGridSpec(
            num_scalar_prefetch=1,                         # idx -> SMEM
            grid=(n_pad // tn,),
            in_specs=[pl.BlockSpec(memory_space=pl.ANY)],  # table stays in HBM
            out_specs=pl.BlockSpec((tn, v_cols), lambda i, ids: (i, 0)),
            scratch_shapes=[
                pltpu.SemaphoreType.DMA((tn,)),
            ],
        ),
        compiler_params=pltpu.CompilerParams(
            dimension_semantics=("parallel",)),
    )(idx_flat, w_pad)

    # Drop padding: exact nn.Embedding output shape and values.
    return logits_pad[:N, :V].reshape(B, T, V)


if __name__ == "__main__":
    key = jax.random.PRNGKey(0)
    k_w, k_idx = jax.random.split(key)

    vocab_size = 65   # typical tiny-shakespeare charset size
    B, T = 2, 8

    # nn.Embedding(vocab_size, vocab_size) weight (~N(0,1) like PyTorch default)
    embedding_table = jax.random.normal(
        k_w, (vocab_size, vocab_size), dtype=jnp.float32)
    idx = jax.random.randint(
        k_idx, (B, T), minval=0, maxval=vocab_size, dtype=jnp.int32)

    logits = bigram_forward(idx, embedding_table)
    logits = jax.block_until_ready(logits)

    # Reference: plain gather, matches PyTorch nn.Embedding semantics.
    ref = embedding_table[idx]
    assert logits.shape == (B, T, vocab_size)
    assert jnp.array_equal(logits, ref)

    print("KERNEL_OK")
</pallas_src>

<mosaic_0001>
module attributes {stable_mosaic.version = 11 : i64} {
  func.func @_bigram_gather_kernel(%arg0: i32, %arg1: memref<16xi32, #tpu.memory_space<smem>>, %arg2: memref<72x128xf32, #tpu.memory_space<any>>, %arg3: memref<8x128xf32, #tpu.memory_space<vmem>>, %arg4: memref<8x!tpu.dma_semaphore, #tpu.memory_space<semaphore_mem>>) attributes {dimension_semantics = [#tpu.dimension_semantics<parallel>], iteration_bounds = array<i64: 2>, scalar_prefetch = 1 : i64, scratch_operands = 1 : i64, tpu.core_type = #tpu.core_type<tc>, window_params = [{}, {transform_indices = @transform_1, window_bounds = array<i64: 8, 128>}]} {
    %c8_i32 = arith.constant 8 : i32
    %0 = arith.muli %arg0, %c8_i32 : i32
    %c0_i32 = arith.constant 0 : i32
    %1 = arith.addi %0, %c0_i32 : i32
    %2 = arith.index_cast %1 : i32 to index
    %3 = memref.load %arg1[%2] : memref<16xi32, #tpu.memory_space<smem>>
    %c0_i32_0 = arith.constant 0 : i32
    %c0_i32_1 = arith.constant 0 : i32
    %c0_i32_2 = arith.constant 0 : i32
    %4 = tpu.memref_slice %arg2[%3, %c0_i32_2] : memref<72x128xf32, #tpu.memory_space<any>> -> memref<1x128xf32, #tpu.memory_space<any>>
    %5 = tpu.memref_squeeze %4 : memref<1x128xf32, #tpu.memory_space<any>> -> memref<128xf32, #tpu.memory_space<any>>
    %c0_i32_3 = arith.constant 0 : i32
    %6 = tpu.memref_slice %arg3[%c0_i32_0, %c0_i32_3] : memref<8x128xf32, #tpu.memory_space<vmem>> -> memref<1x128xf32, #tpu.memory_space<vmem>>
    %7 = tpu.memref_squeeze %6 : memref<1x128xf32, #tpu.memory_space<vmem>> -> memref<128xf32, #tpu.memory_space<vmem>>
    %8 = tpu.memref_slice %arg4[%c0_i32_1] : memref<8x!tpu.dma_semaphore, #tpu.memory_space<semaphore_mem>> -> memref<1x!tpu.dma_semaphore, #tpu.memory_space<semaphore_mem>>
    %9 = tpu.memref_squeeze %8 : memref<1x!tpu.dma_semaphore, #tpu.memory_space<semaphore_mem>> -> memref<!tpu.dma_semaphore, #tpu.memory_space<semaphore_mem>>
    tpu.enqueue_dma source(%5 : memref<128xf32, #tpu.memory_space<any>>) target(%7 : memref<128xf32, #tpu.memory_space<vmem>>) target_semaphore(%9 : memref<!tpu.dma_semaphore, #tpu.memory_space<semaphore_mem>>)
    %c1_i32 = arith.constant 1 : i32
    %10 = arith.addi %0, %c1_i32 : i32
    %11 = arith.index_cast %10 : i32 to index
    %12 = memref.load %arg1[%11] : memref<16xi32, #tpu.memory_space<smem>>
    %c1_i32_4 = arith.constant 1 : i32
    %c1_i32_5 = arith.constant 1 : i32
    %c0_i32_6 = arith.constant 0 : i32
    %13 = tpu.memref_slice %arg2[%12, %c0_i32_6] : memref<72x128xf32, #tpu.memory_space<any>> -> memref<1x128xf32, #tpu.memory_space<any>>
    %14 = tpu.memref_squeeze %13 : memref<1x128xf32, #tpu.memory_space<any>> -> memref<128xf32, #tpu.memory_space<any>>
    %c0_i32_7 = arith.constant 0 : i32
    %15 = tpu.memref_slice %arg3[%c1_i32_4, %c0_i32_7] : memref<8x128xf32, #tpu.memory_space<vmem>> -> memref<1x128xf32, #tpu.memory_space<vmem>>
    %16 = tpu.memref_squeeze %15 : memref<1x128xf32, #tpu.memory_space<vmem>> -> memref<128xf32, #tpu.memory_space<vmem>>
    %17 = tpu.memref_slice %arg4[%c1_i32_5] : memref<8x!tpu.dma_semaphore, #tpu.memory_space<semaphore_mem>> -> memref<1x!tpu.dma_semaphore, #tpu.memory_space<semaphore_mem>>
    %18 = tpu.memref_squeeze %17 : memref<1x!tpu.dma_semaphore, #tpu.memory_space<semaphore_mem>> -> memref<!tpu.dma_semaphore, #tpu.memory_space<semaphore_mem>>
    tpu.enqueue_dma source(%14 : memref<128xf32, #tpu.memory_space<any>>) target(%16 : memref<128xf32, #tpu.memory_space<vmem>>) target_semaphore(%18 : memref<!tpu.dma_semaphore, #tpu.memory_space<semaphore_mem>>)
    %c2_i32 = arith.constant 2 : i32
    %19 = arith.addi %0, %c2_i32 : i32
    %20 = arith.index_cast %19 : i32 to index
    %21 = memref.load %arg1[%20] : memref<16xi32, #tpu.memory_space<smem>>
    %c2_i32_8 = arith.constant 2 : i32
    %c2_i32_9 = arith.constant 2 : i32
    %c0_i32_10 = arith.constant 0 : i32
    %22 = tpu.memref_slice %arg2[%21, %c0_i32_10] : memref<72x128xf32, #tpu.memory_space<any>> -> memref<1x128xf32, #tpu.memory_space<any>>
    %23 = tpu.memref_squeeze %22 : memref<1x128xf32, #tpu.memory_space<any>> -> memref<128xf32, #tpu.memory_space<any>>
    %c0_i32_11 = arith.constant 0 : i32
    %24 = tpu.memref_slice %arg3[%c2_i32_8, %c0_i32_11] : memref<8x128xf32, #tpu.memory_space<vmem>> -> memref<1x128xf32, #tpu.memory_space<vmem>>
    %25 = tpu.memref_squeeze %24 : memref<1x128xf32, #tpu.memory_space<vmem>> -> memref<128xf32, #tpu.memory_space<vmem>>
    %26 = tpu.memref_slice %arg4[%c2_i32_9] : memref<8x!tpu.dma_semaphore, #tpu.memory_space<semaphore_mem>> -> memref<1x!tpu.dma_semaphore, #tpu.memory_space<semaphore_mem>>
    %27 = tpu.memref_squeeze %26 : memref<1x!tpu.dma_semaphore, #tpu.memory_space<semaphore_mem>> -> memref<!tpu.dma_semaphore, #tpu.memory_space<semaphore_mem>>
    tpu.enqueue_dma source(%23 : memref<128xf32, #tpu.memory_space<any>>) target(%25 : memref<128xf32, #tpu.memory_space<vmem>>) target_semaphore(%27 : memref<!tpu.dma_semaphore, #tpu.memory_space<semaphore_mem>>)
    %c3_i32 = arith.constant 3 : i32
    %28 = arith.addi %0, %c3_i32 : i32
    %29 = arith.index_cast %28 : i32 to index
    %30 = memref.load %arg1[%29] : memref<16xi32, #tpu.memory_space<smem>>
    %c3_i32_12 = arith.constant 3 : i32
    %c3_i32_13 = arith.constant 3 : i32
    %c0_i32_14 = arith.constant 0 : i32
    %31 = tpu.memref_slice %arg2[%30, %c0_i32_14] : memref<72x128xf32, #tpu.memory_space<any>> -> memref<1x128xf32, #tpu.memory_space<any>>
    %32 = tpu.memref_squeeze %31 : memref<1x128xf32, #tpu.memory_space<any>> -> memref<128xf32, #tpu.memory_space<any>>
    %c0_i32_15 = arith.constant 0 : i32
    %33 = tpu.memref_slice %arg3[%c3_i32_12, %c0_i32_15] : memref<8x128xf32, #tpu.memory_space<vmem>> -> memref<1x128xf32, #tpu.memory_space<vmem>>
    %34 = tpu.memref_squeeze %33 : memref<1x128xf32, #tpu.memory_space<vmem>> -> memref<128xf32, #tpu.memory_space<vmem>>
    %35 = tpu.memref_slice %arg4[%c3_i32_13] : memref<8x!tpu.dma_semaphore, #tpu.memory_space<semaphore_mem>> -> memref<1x!tpu.dma_semaphore, #tpu.memory_space<semaphore_mem>>
    %36 = tpu.memref_squeeze %35 : memref<1x!tpu.dma_semaphore, #tpu.memory_space<semaphore_mem>> -> memref<!tpu.dma_semaphore, #tpu.memory_space<semaphore_mem>>
    tpu.enqueue_dma source(%32 : memref<128xf32, #tpu.memory_space<any>>) target(%34 : memref<128xf32, #tpu.memory_space<vmem>>) target_semaphore(%36 : memref<!tpu.dma_semaphore, #tpu.memory_space<semaphore_mem>>)
    %c4_i32 = arith.constant 4 : i32
    %37 = arith.addi %0, %c4_i32 : i32
    %38 = arith.index_cast %37 : i32 to index
    %39 = memref.load %arg1[%38] : memref<16xi32, #tpu.memory_space<smem>>
    %c4_i32_16 = arith.constant 4 : i32
    %c4_i32_17 = arith.constant 4 : i32
    %c0_i32_18 = arith.constant 0 : i32
    %40 = tpu.memref_slice %arg2[%39, %c0_i32_18] : memref<72x128xf32, #tpu.memory_space<any>> -> memref<1x128xf32, #tpu.memory_space<any>>
    %41 = tpu.memref_squeeze %40 : memref<1x128xf32, #tpu.memory_space<any>> -> memref<128xf32, #tpu.memory_space<any>>
    %c0_i32_19 = arith.constant 0 : i32
    %42 = tpu.memref_slice %arg3[%c4_i32_16, %c0_i32_19] : memref<8x128xf32, #tpu.memory_space<vmem>> -> memref<1x128xf32, #tpu.memory_space<vmem>>
    %43 = tpu.memref_squeeze %42 : memref<1x128xf32, #tpu.memory_space<vmem>> -> memref<128xf32, #tpu.memory_space<vmem>>
    %44 = tpu.memref_slice %arg4[%c4_i32_17] : memref<8x!tpu.dma_semaphore, #tpu.memory_space<semaphore_mem>> -> memref<1x!tpu.dma_semaphore, #tpu.memory_space<semaphore_mem>>
    %45 = tpu.memref_squeeze %44 : memref<1x!tpu.dma_semaphore, #tpu.memory_space<semaphore_mem>> -> memref<!tpu.dma_semaphore, #tpu.memory_space<semaphore_mem>>
    tpu.enqueue_dma source(%41 : memref<128xf32, #tpu.memory_space<any>>) target(%43 : memref<128xf32, #tpu.memory_space<vmem>>) target_semaphore(%45 : memref<!tpu.dma_semaphore, #tpu.memory_space<semaphore_mem>>)
    %c5_i32 = arith.constant 5 : i32
    %46 = arith.addi %0, %c5_i32 : i32
    %47 = arith.index_cast %46 : i32 to index
    %48 = memref.load %arg1[%47] : memref<16xi32, #tpu.memory_space<smem>>
    %c5_i32_20 = arith.constant 5 : i32
    %c5_i32_21 = arith.constant 5 : i32
    %c0_i32_22 = arith.constant 0 : i32
    %49 = tpu.memref_slice %arg2[%48, %c0_i32_22] : memref<72x128xf32, #tpu.memory_space<any>> -> memref<1x128xf32, #tpu.memory_space<any>>
    %50 = tpu.memref_squeeze %49 : memref<1x128xf32, #tpu.memory_space<any>> -> memref<128xf32, #tpu.memory_space<any>>
    %c0_i32_23 = arith.constant 0 : i32
    %51 = tpu.memref_slice %arg3[%c5_i32_20, %c0_i32_23] : memref<8x128xf32, #tpu.memory_space<vmem>> -> memref<1x128xf32, #tpu.memory_space<vmem>>
    %52 = tpu.memref_squeeze %51 : memref<1x128xf32, #tpu.memory_space<vmem>> -> memref<128xf32, #tpu.memory_space<vmem>>
    %53 = tpu.memref_slice %arg4[%c5_i32_21] : memref<8x!tpu.dma_semaphore, #tpu.memory_space<semaphore_mem>> -> memref<1x!tpu.dma_semaphore, #tpu.memory_space<semaphore_mem>>
    %54 = tpu.memref_squeeze %53 : memref<1x!tpu.dma_semaphore, #tpu.memory_space<semaphore_mem>> -> memref<!tpu.dma_semaphore, #tpu.memory_space<semaphore_mem>>
    tpu.enqueue_dma source(%50 : memref<128xf32, #tpu.memory_space<any>>) target(%52 : memref<128xf32, #tpu.memory_space<vmem>>) target_semaphore(%54 : memref<!tpu.dma_semaphore, #tpu.memory_space<semaphore_mem>>)
    %c6_i32 = arith.constant 6 : i32
    %55 = arith.addi %0, %c6_i32 : i32
    %56 = arith.index_cast %55 : i32 to index
    %57 = memref.load %arg1[%56] : memref<16xi32, #tpu.memory_space<smem>>
    %c6_i32_24 = arith.constant 6 : i32
    %c6_i32_25 = arith.constant 6 : i32
    %c0_i32_26 = arith.constant 0 : i32
    %58 = tpu.memref_slice %arg2[%57, %c0_i32_26] : memref<72x128xf32, #tpu.memory_space<any>> -> memref<1x128xf32, #tpu.memory_space<any>>
    %59 = tpu.memref_squeeze %58 : memref<1x128xf32, #tpu.memory_space<any>> -> memref<128xf32, #tpu.memory_space<any>>
    %c0_i32_27 = arith.constant 0 : i32
    %60 = tpu.memref_slice %arg3[%c6_i32_24, %c0_i32_27] : memref<8x128xf32, #tpu.memory_space<vmem>> -> memref<1x128xf32, #tpu.memory_space<vmem>>
    %61 = tpu.memref_squeeze %60 : memref<1x128xf32, #tpu.memory_space<vmem>> -> memref<128xf32, #tpu.memory_space<vmem>>
    %62 = tpu.memref_slice %arg4[%c6_i32_25] : memref<8x!tpu.dma_semaphore, #tpu.memory_space<semaphore_mem>> -> memref<1x!tpu.dma_semaphore, #tpu.memory_space<semaphore_mem>>
    %63 = tpu.memref_squeeze %62 : memref<1x!tpu.dma_semaphore, #tpu.memory_space<semaphore_mem>> -> memref<!tpu.dma_semaphore, #tpu.memory_space<semaphore_mem>>
    tpu.enqueue_dma source(%59 : memref<128xf32, #tpu.memory_space<any>>) target(%61 : memref<128xf32, #tpu.memory_space<vmem>>) target_semaphore(%63 : memref<!tpu.dma_semaphore, #tpu.memory_space<semaphore_mem>>)
    %c7_i32 = arith.constant 7 : i32
    %64 = arith.addi %0, %c7_i32 : i32
    %65 = arith.index_cast %64 : i32 to index
    %66 = memref.load %arg1[%65] : memref<16xi32, #tpu.memory_space<smem>>
    %c7_i32_28 = arith.constant 7 : i32
    %c7_i32_29 = arith.constant 7 : i32
    %c0_i32_30 = arith.constant 0 : i32
    %67 = tpu.memref_slice %arg2[%66, %c0_i32_30] : memref<72x128xf32, #tpu.memory_space<any>> -> memref<1x128xf32, #tpu.memory_space<any>>
    %68 = tpu.memref_squeeze %67 : memref<1x128xf32, #tpu.memory_space<any>> -> memref<128xf32, #tpu.memory_space<any>>
    %c0_i32_31 = arith.constant 0 : i32
    %69 = tpu.memref_slice %arg3[%c7_i32_28, %c0_i32_31] : memref<8x128xf32, #tpu.memory_space<vmem>> -> memref<1x128xf32, #tpu.memory_space<vmem>>
    %70 = tpu.memref_squeeze %69 : memref<1x128xf32, #tpu.memory_space<vmem>> -> memref<128xf32, #tpu.memory_space<vmem>>
    %71 = tpu.memref_slice %arg4[%c7_i32_29] : memref<8x!tpu.dma_semaphore, #tpu.memory_space<semaphore_mem>> -> memref<1x!tpu.dma_semaphore, #tpu.memory_space<semaphore_mem>>
    %72 = tpu.memref_squeeze %71 : memref<1x!tpu.dma_semaphore, #tpu.memory_space<semaphore_mem>> -> memref<!tpu.dma_semaphore, #tpu.memory_space<semaphore_mem>>
    tpu.enqueue_dma source(%68 : memref<128xf32, #tpu.memory_space<any>>) target(%70 : memref<128xf32, #tpu.memory_space<vmem>>) target_semaphore(%72 : memref<!tpu.dma_semaphore, #tpu.memory_space<semaphore_mem>>)
    %c0_i32_32 = arith.constant 0 : i32
    %c0_i32_33 = arith.constant 0 : i32
    %c0_i32_34 = arith.constant 0 : i32
    %73 = tpu.memref_slice %arg2[%3, %c0_i32_34] : memref<72x128xf32, #tpu.memory_space<any>> -> memref<1x128xf32, #tpu.memory_space<any>>
    %74 = tpu.memref_squeeze %73 : memref<1x128xf32, #tpu.memory_space<any>> -> memref<128xf32, #tpu.memory_space<any>>
    %c0_i32_35 = arith.constant 0 : i32
    %75 = tpu.memref_slice %arg3[%c0_i32_32, %c0_i32_35] : memref<8x128xf32, #tpu.memory_space<vmem>> -> memref<1x128xf32, #tpu.memory_space<vmem>>
    %76 = tpu.memref_squeeze %75 : memref<1x128xf32, #tpu.memory_space<vmem>> -> memref<128xf32, #tpu.memory_space<vmem>>
    %77 = tpu.memref_slice %arg4[%c0_i32_33] : memref<8x!tpu.dma_semaphore, #tpu.memory_space<semaphore_mem>> -> memref<1x!tpu.dma_semaphore, #tpu.memory_space<semaphore_mem>>
    %78 = tpu.memref_squeeze %77 : memref<1x!tpu.dma_semaphore, #tpu.memory_space<semaphore_mem>> -> memref<!tpu.dma_semaphore, #tpu.memory_space<semaphore_mem>>
    tpu.wait_dma2 semaphore(%78 : memref<!tpu.dma_semaphore, #tpu.memory_space<semaphore_mem>>) src(%74 : memref<128xf32, #tpu.memory_space<any>>) dst(%76 : memref<128xf32, #tpu.memory_space<vmem>>)
    %c1_i32_36 = arith.constant 1 : i32
    %c1_i32_37 = arith.constant 1 : i32
    %c0_i32_38 = arith.constant 0 : i32
    %79 = tpu.memref_slice %arg2[%12, %c0_i32_38] : memref<72x128xf32, #tpu.memory_space<any>> -> memref<1x128xf32, #tpu.memory_space<any>>
    %80 = tpu.memref_squeeze %79 : memref<1x128xf32, #tpu.memory_space<any>> -> memref<128xf32, #tpu.memory_space<any>>
    %c0_i32_39 = arith.constant 0 : i32
    %81 = tpu.memref_slice %arg3[%c1_i32_36, %c0_i32_39] : memref<8x128xf32, #tpu.memory_space<vmem>> -> memref<1x128xf32, #tpu.memory_space<vmem>>
    %82 = tpu.memref_squeeze %81 : memref<1x128xf32, #tpu.memory_space<vmem>> -> memref<128xf32, #tpu.memory_space<vmem>>
    %83 = tpu.memref_slice %arg4[%c1_i32_37] : memref<8x!tpu.dma_semaphore, #tpu.memory_space<semaphore_mem>> -> memref<1x!tpu.dma_semaphore, #tpu.memory_space<semaphore_mem>>
    %84 = tpu.memref_squeeze %83 : memref<1x!tpu.dma_semaphore, #tpu.memory_space<semaphore_mem>> -> memref<!tpu.dma_semaphore, #tpu.memory_space<semaphore_mem>>
    tpu.wait_dma2 semaphore(%84 : memref<!tpu.dma_semaphore, #tpu.memory_space<semaphore_mem>>) src(%80 : memref<128xf32, #tpu.memory_space<any>>) dst(%82 : memref<128xf32, #tpu.memory_space<vmem>>)
    %c2_i32_40 = arith.constant 2 : i32
    %c2_i32_41 = arith.constant 2 : i32
    %c0_i32_42 = arith.constant 0 : i32
    %85 = tpu.memref_slice %arg2[%21, %c0_i32_42] : memref<72x128xf32, #tpu.memory_space<any>> -> memref<1x128xf32, #tpu.memory_space<any>>
    %86 = tpu.memref_squeeze %85 : memref<1x128xf32, #tpu.memory_space<any>> -> memref<128xf32, #tpu.memory_space<any>>
    %c0_i32_43 = arith.constant 0 : i32
    %87 = tpu.memref_slice %arg3[%c2_i32_40, %c0_i32_43] : memref<8x128xf32, #tpu.memory_space<vmem>> -> memref<1x128xf32, #tpu.memory_space<vmem>>
    %88 = tpu.memref_squeeze %87 : memref<1x128xf32, #tpu.memory_space<vmem>> -> memref<128xf32, #tpu.memory_space<vmem>>
    %89 = tpu.memref_slice %arg4[%c2_i32_41] : memref<8x!tpu.dma_semaphore, #tpu.memory_space<semaphore_mem>> -> memref<1x!tpu.dma_semaphore, #tpu.memory_space<semaphore_mem>>
    %90 = tpu.memref_squeeze %89 : memref<1x!tpu.dma_semaphore, #tpu.memory_space<semaphore_mem>> -> memref<!tpu.dma_semaphore, #tpu.memory_space<semaphore_mem>>
    tpu.wait_dma2 semaphore(%90 : memref<!tpu.dma_semaphore, #tpu.memory_space<semaphore_mem>>) src(%86 : memref<128xf32, #tpu.memory_space<any>>) dst(%88 : memref<128xf32, #tpu.memory_space<vmem>>)
    %c3_i32_44 = arith.constant 3 : i32
    %c3_i32_45 = arith.constant 3 : i32
    %c0_i32_46 = arith.constant 0 : i32
    %91 = tpu.memref_slice %arg2[%30, %c0_i32_46] : memref<72x128xf32, #tpu.memory_space<any>> -> memref<1x128xf32, #tpu.memory_space<any>>
    %92 = tpu.memref_squeeze %91 : memref<1x128xf32, #tpu.memory_space<any>> -> memref<128xf32, #tpu.memory_space<any>>
    %c0_i32_47 = arith.constant 0 : i32
    %93 = tpu.memref_slice %arg3[%c3_i32_44, %c0_i32_47] : memref<8x128xf32, #tpu.memory_space<vmem>> -> memref<1x128xf32, #tpu.memory_space<vmem>>
    %94 = tpu.memref_squeeze %93 : memref<1x128xf32, #tpu.memory_space<vmem>> -> memref<128xf32, #tpu.memory_space<vmem>>
    %95 = tpu.memref_slice %arg4[%c3_i32_45] : memref<8x!tpu.dma_semaphore, #tpu.memory_space<semaphore_mem>> -> memref<1x!tpu.dma_semaphore, #tpu.memory_space<semaphore_mem>>
    %96 = tpu.memref_squeeze %95 : memref<1x!tpu.dma_semaphore, #tpu.memory_space<semaphore_mem>> -> memref<!tpu.dma_semaphore, #tpu.memory_space<semaphore_mem>>
    tpu.wait_dma2 semaphore(%96 : memref<!tpu.dma_semaphore, #tpu.memory_space<semaphore_mem>>) src(%92 : memref<128xf32, #tpu.memory_space<any>>) dst(%94 : memref<128xf32, #tpu.memory_space<vmem>>)
    %c4_i32_48 = arith.constant 4 : i32
    %c4_i32_49 = arith.constant 4 : i32
    %c0_i32_50 = arith.constant 0 : i32
    %97 = tpu.memref_slice %arg2[%39, %c0_i32_50] : memref<72x128xf32, #tpu.memory_space<any>> -> memref<1x128xf32, #tpu.memory_space<any>>
    %98 = tpu.memref_squeeze %97 : memref<1x128xf32, #tpu.memory_space<any>> -> memref<128xf32, #tpu.memory_space<any>>
    %c0_i32_51 = arith.constant 0 : i32
    %99 = tpu.memref_slice %arg3[%c4_i32_48, %c0_i32_51] : memref<8x128xf32, #tpu.memory_space<vmem>> -> memref<1x128xf32, #tpu.memory_space<vmem>>
    %100 = tpu.memref_squeeze %99 : memref<1x128xf32, #tpu.memory_space<vmem>> -> memref<128xf32, #tpu.memory_space<vmem>>
    %101 = tpu.memref_slice %arg4[%c4_i32_49] : memref<8x!tpu.dma_semaphore, #tpu.memory_space<semaphore_mem>> -> memref<1x!tpu.dma_semaphore, #tpu.memory_space<semaphore_mem>>
    %102 = tpu.memref_squeeze %101 : memref<1x!tpu.dma_semaphore, #tpu.memory_space<semaphore_mem>> -> memref<!tpu.dma_semaphore, #tpu.memory_space<semaphore_mem>>
    tpu.wait_dma2 semaphore(%102 : memref<!tpu.dma_semaphore, #tpu.memory_space<semaphore_mem>>) src(%98 : memref<128xf32, #tpu.memory_space<any>>) dst(%100 : memref<128xf32, #tpu.memory_space<vmem>>)
    %c5_i32_52 = arith.constant 5 : i32
    %c5_i32_53 = arith.constant 5 : i32
    %c0_i32_54 = arith.constant 0 : i32
    %103 = tpu.memref_slice %arg2[%48, %c0_i32_54] : memref<72x128xf32, #tpu.memory_space<any>> -> memref<1x128xf32, #tpu.memory_space<any>>
    %104 = tpu.memref_squeeze %103 : memref<1x128xf32, #tpu.memory_space<any>> -> memref<128xf32, #tpu.memory_space<any>>
    %c0_i32_55 = arith.constant 0 : i32
    %105 = tpu.memref_slice %arg3[%c5_i32_52, %c0_i32_55] : memref<8x128xf32, #tpu.memory_space<vmem>> -> memref<1x128xf32, #tpu.memory_space<vmem>>
    %106 = tpu.memref_squeeze %105 : memref<1x128xf32, #tpu.memory_space<vmem>> -> memref<128xf32, #tpu.memory_space<vmem>>
    %107 = tpu.memref_slice %arg4[%c5_i32_53] : memref<8x!tpu.dma_semaphore, #tpu.memory_space<semaphore_mem>> -> memref<1x!tpu.dma_semaphore, #tpu.memory_space<semaphore_mem>>
    %108 = tpu.memref_squeeze %107 : memref<1x!tpu.dma_semaphore, #tpu.memory_space<semaphore_mem>> -> memref<!tpu.dma_semaphore, #tpu.memory_space<semaphore_mem>>
    tpu.wait_dma2 semaphore(%108 : memref<!tpu.dma_semaphore, #tpu.memory_space<semaphore_mem>>) src(%104 : memref<128xf32, #tpu.memory_space<any>>) dst(%106 : memref<128xf32, #tpu.memory_space<vmem>>)
    %c6_i32_56 = arith.constant 6 : i32
    %c6_i32_57 = arith.constant 6 : i32
    %c0_i32_58 = arith.constant 0 : i32
    %109 = tpu.memref_slice %arg2[%57, %c0_i32_58] : memref<72x128xf32, #tpu.memory_space<any>> -> memref<1x128xf32, #tpu.memory_space<any>>
    %110 = tpu.memref_squeeze %109 : memref<1x128xf32, #tpu.memory_space<any>> -> memref<128xf32, #tpu.memory_space<any>>
    %c0_i32_59 = arith.constant 0 : i32
    %111 = tpu.memref_slice %arg3[%c6_i32_56, %c0_i32_59] : memref<8x128xf32, #tpu.memory_space<vmem>> -> memref<1x128xf32, #tpu.memory_space<vmem>>
    %112 = tpu.memref_squeeze %111 : memref<1x128xf32, #tpu.memory_space<vmem>> -> memref<128xf32, #tpu.memory_space<vmem>>
    %113 = tpu.memref_slice %arg4[%c6_i32_57] : memref<8x!tpu.dma_semaphore, #tpu.memory_space<semaphore_mem>> -> memref<1x!tpu.dma_semaphore, #tpu.memory_space<semaphore_mem>>
    %114 = tpu.memref_squeeze %113 : memref<1x!tpu.dma_semaphore, #tpu.memory_space<semaphore_mem>> -> memref<!tpu.dma_semaphore, #tpu.memory_space<semaphore_mem>>
    tpu.wait_dma2 semaphore(%114 : memref<!tpu.dma_semaphore, #tpu.memory_space<semaphore_mem>>) src(%110 : memref<128xf32, #tpu.memory_space<any>>) dst(%112 : memref<128xf32, #tpu.memory_space<vmem>>)
    %c7_i32_60 = arith.constant 7 : i32
    %c7_i32_61 = arith.constant 7 : i32
    %c0_i32_62 = arith.constant 0 : i32
    %115 = tpu.memref_slice %arg2[%66, %c0_i32_62] : memref<72x128xf32, #tpu.memory_space<any>> -> memref<1x128xf32, #tpu.memory_space<any>>
    %116 = tpu.memref_squeeze %115 : memref<1x128xf32, #tpu.memory_space<any>> -> memref<128xf32, #tpu.memory_space<any>>
    %c0_i32_63 = arith.constant 0 : i32
    %117 = tpu.memref_slice %arg3[%c7_i32_60, %c0_i32_63] : memref<8x128xf32, #tpu.memory_space<vmem>> -> memref<1x128xf32, #tpu.memory_space<vmem>>
    %118 = tpu.memref_squeeze %117 : memref<1x128xf32, #tpu.memory_space<vmem>> -> memref<128xf32, #tpu.memory_space<vmem>>
    %119 = tpu.memref_slice %arg4[%c7_i32_61] : memref<8x!tpu.dma_semaphore, #tpu.memory_space<semaphore_mem>> -> memref<1x!tpu.dma_semaphore, #tpu.memory_space<semaphore_mem>>
    %120 = tpu.memref_squeeze %119 : memref<1x!tpu.dma_semaphore, #tpu.memory_space<semaphore_mem>> -> memref<!tpu.dma_semaphore, #tpu.memory_space<semaphore_mem>>
    tpu.wait_dma2 semaphore(%120 : memref<!tpu.dma_semaphore, #tpu.memory_space<semaphore_mem>>) src(%116 : memref<128xf32, #tpu.memory_space<any>>) dst(%118 : memref<128xf32, #tpu.memory_space<vmem>>)
    return
  }
  func.func @transform_1(%arg0: i32, %arg1: memref<16xi32, #tpu.memory_space<smem>>) -> (i32, i32) {
    %c0_i32 = arith.constant 0 : i32
    %c0_i32_0 = arith.constant 0 : i32
    return %arg0, %c0_i32 : i32, i32
  }
}

</mosaic_0001>

<bundles_post_ra>
// kernel: bigram_forward.1
= control target key start
LH: loop header
LB: loop body
LE: loop exit
PB: predicated region body
PF: predicated region fallthrough
CT: control target
= control target key end

     0   :  { %s817_s0 = inlined_call_operand.vmem [shape: s32[16], index: 0, kind: input, shape index: {}]   ;;  %s818_s1 = inlined_call_operand.vmem [shape: f32[72,128], index: 1, kind: input, shape index: {}]   ;;  %s819_s2 = inlined_call_operand.vmem [shape: f32[16,128], index: 2, kind: output, shape index: {}]  }
   0x1   :  { %s7_s11 = sshll.u32 %s817_s0, 4  ;;  %s8_s11 = int_to_ptr.vmem [resolvable:$true] %s7_s11 }
   0x2   :  { %s701_s12 = scalar_lea.vmem %s8_s11, 16  ;;  %p706_p1 = scmp.lt.s32.totalorder %s8_s11, %s8_s11 }
   0x3   :  { %p702_p0 = scmp.ne.s32.totalorder %s8_s11, %s701_s12  ;;  %p707_p2 = scmp.lt.s32.totalorder %s701_s12, %s701_s12 }
   0x5   :  { %p708_p3 = por %p707_p2, %p706_p1 }
   0x7   :  { %p709_p4 = pnand %p708_p3, %p702_p0 }
   0x9   :  { %712 = shalt.err (!%p709_p4)  }
   0xa   :  { %s739_s13 = smov [#allocation4]  }
   0xb   :  { %10 = dma.vmem_to_smem %s8_s11, 16, %s739_s13, [#allocation3] }
   0xc   :  { %717 = dma.done.wait [#allocation3], 16 }
   0xd   :  { %718 = vsyncadd [#allocation3], 4294967280 }
   0xe   :  { %12 = sfence }
   0xf   :  { %s758_s14 = smov 0  }
  0x10 LB: > { %p665_p5 = scmp.ge.s32.totalorder %s737_s14, 2  ;;  %s737_s14 = sphi %s758_s14, %s18_s14  }
  0x11   : > { %p50_p6 = scmp.lt.s32.totalorder (!%p665_p5), %s737_s14, 1  ;;  %s766_s0 = sshll.u32 (!%p665_p5), %s737_s14, 3 }
  0x12   : > { %43 = sbr.rel (%p665_p5) target bundleno = 115 (0x73), region = 12  ;;  %s55_s15 = sld [smem:[#allocation4 + %s766_s0]] (!%p665_p5) }
  0x17   : > { %s51_s16 = scalar_select %p50_p6, %s737_s14, 1 }
  0x18   : > { %s56_s23 = scalar_lea.vmem %s818_s1, %s55_s15 }
  0x19   : > { %s666_s17 = sshll.u32 %s51_s16, 3  ;;  %v75_v0 = vld [vmem:[%s56_s23] sm:$0x1] }
  0x1a   : > { %s773_s20 = scalar_lea.vmem %s819_s2, %s666_s17 }
  0x1b   : > { %76 = vst [vmem:[%s773_s20] sm:$0x1] %v75_v0 }
  0x1c   : > { %102 = vsyncadd [#allocation2], 16  ;;  %s103_s24 = sadd.s32 1, %s766_s0 }
  0x1d   : > { %s104_s25 = sld [smem:[#allocation4 + %s103_s24]] }
  0x23   : > { %s105_s28 = scalar_lea.vmem %s818_s1, %s104_s25 }
  0x24   : > { %v126_v1 = vld [vmem:[%s105_s28] sm:$0x1] }
  0x25   : > { %669 = vst [vmem:[%s773_s20 + $0x1] sm:$0x1] %v126_v1 }
  0x26   : > { %153 = vsyncadd [#allocation2 + $0x1], 16  ;;  %s154_s29 = sadd.s32 2, %s766_s0 }
  0x27   : > { %s155_s30 = sld [smem:[#allocation4 + %s154_s29]] }
  0x2d   : > { %s156_s5 = scalar_lea.vmem %s818_s1, %s155_s30 }
  0x2e   : > { %v177_v2 = vld [vmem:[%s156_s5] sm:$0x1] }
  0x2f   : > { %671 = vst [vmem:[%s773_s20 + $0x2] sm:$0x1] %v177_v2 }
  0x30   : > { %204 = vsyncadd [#allocation2 + $0x2], 16  ;;  %s205_s6 = sadd.s32 3, %s766_s0 }
  0x31   : > { %s206_s7 = sld [smem:[#allocation4 + %s205_s6]] }
  0x37   : > { %s207_s10 = scalar_lea.vmem %s818_s1, %s206_s7 }
  0x38   : > { %v228_v3 = vld [vmem:[%s207_s10] sm:$0x1] }
  0x39   : > { %673 = vst [vmem:[%s773_s20 + $0x3] sm:$0x1] %v228_v3 }
  0x3a   : > { %255 = vsyncadd [#allocation2 + $0x3], 16  ;;  %s256_s11 = sadd.s32 4, %s766_s0 }
  0x3b   : > { %s257_s12 = sld [smem:[#allocation4 + %s256_s11]] }
  0x41   : > { %s258_s16 = scalar_lea.vmem %s818_s1, %s257_s12 }
  0x42   : > { %v279_v4 = vld [vmem:[%s258_s16] sm:$0x1] }
  0x43   : > { %675 = vst [vmem:[%s773_s20 + $0x4] sm:$0x1] %v279_v4 }
  0x44   : > { %306 = vsyncadd [#allocation2 + $0x4], 16  ;;  %s307_s17 = sadd.s32 5, %s766_s0 }
  0x45   : > { %s308_s18 = sld [smem:[#allocation4 + %s307_s17]] }
  0x4b   : > { %s309_s22 = scalar_lea.vmem %s818_s1, %s308_s18 }
  0x4c   : > { %v330_v5 = vld [vmem:[%s309_s22] sm:$0x1] }
  0x4d   : > { %677 = vst [vmem:[%s773_s20 + $0x5] sm:$0x1] %v330_v5 }
  0x4e   : > { %357 = vsyncadd [#allocation2 + $0x5], 16  ;;  %s358_s23 = sadd.s32 6, %s766_s0 }
  0x4f   : > { %s359_s24 = sld [smem:[#allocation4 + %s358_s23]] }
  0x55   : > { %s360_s27 = scalar_lea.vmem %s818_s1, %s359_s24 }
  0x56   : > { %v381_v6 = vld [vmem:[%s360_s27] sm:$0x1] }
  0x57   : > { %679 = vst [vmem:[%s773_s20 + $0x6] sm:$0x1] %v381_v6 }
  0x58   : > { %408 = vsyncadd [#allocation2 + $0x6], 16  ;;  %s409_s28 = sadd.s32 7, %s766_s0 }
  0x59   : > { %s410_s29 = sld [smem:[#allocation4 + %s409_s28]] }
  0x5f   : > { %s411_s4 = scalar_lea.vmem %s818_s1, %s410_s29 }
  0x60   : > { %v432_v7 = vld [vmem:[%s411_s4] sm:$0x1] }
  0x61   : > { %681 = vst [vmem:[%s773_s20 + $0x7] sm:$0x1] %v432_v7 }
  0x62   : > { %459 = vsyncadd [#allocation2 + $0x7], 16 }
  0x63   : > { %719 = dma.done.wait [#allocation2], 16 }
  0x64   : > { %720 = vsyncadd [#allocation2], 4294967280 }
  0x65   : > { %721 = dma.done.wait [#allocation2 + $0x1], 16 }
  0x66   : > { %722 = vsyncadd [#allocation2 + $0x1], 4294967280 }
  0x67   : > { %723 = dma.done.wait [#allocation2 + $0x2], 16 }
  0x68   : > { %724 = vsyncadd [#allocation2 + $0x2], 4294967280 }
  0x69   : > { %725 = dma.done.wait [#allocation2 + $0x3], 16 }
  0x6a   : > { %726 = vsyncadd [#allocation2 + $0x3], 4294967280 }
  0x6b   : > { %727 = dma.done.wait [#allocation2 + $0x4], 16 }
  0x6c   : > { %728 = vsyncadd [#allocation2 + $0x4], 4294967280 }
  0x6d   : > { %729 = dma.done.wait [#allocation2 + $0x5], 16 }
  0x6e   : > { %730 = vsyncadd [#allocation2 + $0x5], 4294967280 }
  0x6f   : > { %731 = dma.done.wait [#allocation2 + $0x6], 16 }
  0x70   : > { %732 = vsyncadd [#allocation2 + $0x6], 4294967280 }
  0x71   : > { %733 = dma.done.wait [#allocation2 + $0x7], 16 }
  0x72   : > { %734 = vsyncadd [#allocation2 + $0x7], 4294967280 }
  0x73 PF: > { %s18_s14 = sadd.s32 1, %s737_s14  }
  0x74   : > { %p15_p7 = scmp.ge.s32.totalorder %s18_s14, 3  }
  0x76   :  { %17 = sbr.rel (!%p15_p7) target bundleno = 16 (0x10), region = 388 }
  0x7b   :  { %495 = vsyncmov [#allocation2] }
  0x7e   :  { %s496_s0 = vpop.sfrf %495 }
  0x7f   :  { %p684_p8 = scmp.ne.s32.totalorder %s496_s0, 0 }
  0x81   :  { %500 = shalt.err (%p684_p8)  }
  0x82   :  { %502 = vsyncmov [#allocation2 + $0x1] }
  0x85   :  { %s503_s20 = vpop.sfrf %502 }
  0x86   :  { %p685_p9 = scmp.ne.s32.totalorder %s503_s20, 0 }
  0x88   :  { %507 = shalt.err (%p685_p9)  }
  0x89   :  { %509 = vsyncmov [#allocation2 + $0x2] }
  0x8c   :  { %s510_s5 = vpop.sfrf %509 }
  0x8d   :  { %p686_p10 = scmp.ne.s32.totalorder %s510_s5, 0 }
  0x8f   :  { %514 = shalt.err (%p686_p10)  }
  0x90   :  { %516 = vsyncmov [#allocation2 + $0x3] }
  0x93   :  { %s517_s6 = vpop.sfrf %516 }
  0x94   :  { %p687_p11 = scmp.ne.s32.totalorder %s517_s6, 0 }
  0x96   :  { %521 = shalt.err (%p687_p11)  }
  0x97   :  { %523 = vsyncmov [#allocation2 + $0x4] }
  0x9a   :  { %s524_s7 = vpop.sfrf %523 }
  0x9b   :  { %p688_p12 = scmp.ne.s32.totalorder %s524_s7, 0 }
  0x9d   :  { %528 = shalt.err (%p688_p12)  }
  0x9e   :  { %530 = vsyncmov [#allocation2 + $0x5] }
  0xa1   :  { %s531_s1 = vpop.sfrf %530 }
  0xa2   :  { %p689_p13 = scmp.ne.s32.totalorder %s531_s1, 0 }
  0xa4   :  { %535 = shalt.err (%p689_p13)  }
  0xa5   :  { %537 = vsyncmov [#allocation2 + $0x6] }
  0xa8   :  { %s538_s2 = vpop.sfrf %537 }
  0xa9   :  { %p690_p0 = scmp.ne.s32.totalorder %s538_s2, 0 }
  0xab   :  { %542 = shalt.err (%p690_p0)  }
  0xac   :  { %544 = vsyncmov [#allocation2 + $0x7] }
  0xaf   :  { %s545_s14 = vpop.sfrf %544 }
  0xb0   :  { %p691_p1 = scmp.ne.s32.totalorder %s545_s14, 0 }
  0xb2   :  { %549 = shalt.err (%p691_p1)  }

</bundles_post_ra>
